<compile_context>
chip_gen: v7x
topology: tpu7x:2x2x1
jax: 0.10.0
libtpu: 0.0.40
codegen_flags: <defaults>
</compile_context>

<pallas_src>
import functools

import jax
import jax.numpy as jnp
from jax.experimental import pallas as pl
from jax.experimental.pallas import tpu as pltpu

X_IN = 2
H = 50
X_OUT = 50
HP = 128           # hidden dim padded to full lane width
DEFAULT_TILE = 1024


def _round_up(a, b):
    return ((a + b - 1) // b) * b


def _softplus(v):
    # Matches torch.nn.Softplus(beta=1, threshold=20): linear for v > 20.
    # (exp may overflow to inf for very large v, but the where selects v there.)
    return jnp.where(v > 20.0, v, jnp.log1p(jnp.exp(v)))


def _mlp_kernel(x_ref, w1_ref, b1_ref, w2_ref, b2_ref, w3_ref, b3_ref,
                w4_ref, b4_ref, o_ref, *, hidden_dtype):
    x = x_ref[...].astype(jnp.float32)                       # (bt, 2)
    w1 = w1_ref[...].astype(jnp.float32)                     # (2, 128)

    # Layer 1: K=2 contraction as a VPU broadcast-FMA (skip the MXU round trip).
    h = x[:, 0:1] * w1[0:1, :] + x[:, 1:2] * w1[1:2, :] + b1_ref[...]
    h = _softplus(h).astype(hidden_dtype)                    # (bt, 128)

    h = jnp.dot(h, w2_ref[...], preferred_element_type=jnp.float32) + b2_ref[...]
    h = _softplus(h).astype(hidden_dtype)

    h = jnp.dot(h, w3_ref[...], preferred_element_type=jnp.float32) + b3_ref[...]
    h = _softplus(h).astype(hidden_dtype)

    # Final layer: W4 pads rows only -> output is exactly (bt, 50), so the HBM
    # output stream stays 50 wide (no 2.56x extra write traffic).
    h = jnp.dot(h, w4_ref[...], preferred_element_type=jnp.float32) + b4_ref[...]
    o_ref[...] = h.astype(o_ref.dtype)


def _pad_params(params, hidden_dtype):
    """Zero-pad H=50 -> HP=128 lane-wide once, outside the kernel."""
    pad_h = HP - H
    w1 = jnp.pad(params["w1"], ((0, 0), (0, pad_h)))          # (2, 128)
    b1 = jnp.pad(params["b1"], ((0, 0), (0, pad_h)))          # (1, 128)
    w2 = jnp.pad(params["w2"], ((0, pad_h), (0, pad_h)))      # (128, 128)
    b2 = jnp.pad(params["b2"], ((0, 0), (0, pad_h)))          # (1, 128)
    w3 = jnp.pad(params["w3"], ((0, pad_h), (0, pad_h)))      # (128, 128)
    b3 = jnp.pad(params["b3"], ((0, 0), (0, pad_h)))          # (1, 128)
    w4 = jnp.pad(params["w4"], ((0, pad_h), (0, 0)))          # (128, 50) rows only
    b4 = params["b4"]                                          # (1, 50)
    if hidden_dtype != jnp.float32:
        w2 = w2.astype(hidden_dtype)
        w3 = w3.astype(hidden_dtype)
        w4 = w4.astype(hidden_dtype)
    return w1, b1, w2, b2, w3, b3, w4, b4


def model_latent_f(x, params, *, batch_tile=DEFAULT_TILE,
                   hidden_dtype=jnp.float32):
    """Forward pass of ModelLatentF as a single Pallas kernel.

    x: (N, X_IN) float32.  params: dict of transposed weights / biases.
    hidden_dtype: jnp.bfloat16 on v6e/v7x for higher MXU/EUP throughput
      (loosen tolerance to ~1e-2); jnp.float32 (default) matches the reference
      to 1e-5 and is the right choice on v5e.
    """
    n, x_in = x.shape
    assert x_in == X_IN

    # Effective batch tile: multiple of 8 (f32 sublane), no larger than needed.
    bt = max(8, min(_round_up(batch_tile, 8), _round_up(n, 8)))
    n_pad = _round_up(n, bt)
    if n_pad != n:
        x = jnp.pad(x, ((0, n_pad - n), (0, 0)))

    w1, b1, w2, b2, w3, b3, w4, b4 = _pad_params(params, hidden_dtype)

    def full_spec(arr):
        return pl.BlockSpec(arr.shape, lambda i: (0,) * arr.ndim)

    grid = (n_pad // bt,)

    cost = pl.CostEstimate(
        flops=2 * n_pad * (X_IN * HP + 2 * HP * HP + HP * X_OUT),
        transcendentals=6 * HP * n_pad,          # exp + log1p per softplus, x3
        bytes_accessed=n_pad * 4 * (X_IN + X_OUT)
        + 4 * (w1.size + b1.size + w2.size + b2.size
               + w3.size + b3.size + w4.size + b4.size),
    )

    kernel = functools.partial(_mlp_kernel, hidden_dtype=hidden_dtype)

    out = pl.pallas_call(
        kernel,
        out_shape=jax.ShapeDtypeStruct((n_pad, X_OUT), jnp.float32),
        grid_spec=pltpu.PrefetchScalarGridSpec(
            num_scalar_prefetch=0,
            grid=grid,
            in_specs=[
                pl.BlockSpec((bt, X_IN), lambda i: (i, 0)),
                full_spec(w1), full_spec(b1),
                full_spec(w2), full_spec(b2),
                full_spec(w3), full_spec(b3),
                full_spec(w4), full_spec(b4),
            ],
            out_specs=pl.BlockSpec((bt, X_OUT), lambda i: (i, 0)),
        ),
        compiler_params=pltpu.CompilerParams(
            dimension_semantics=("parallel",)),
        cost_estimate=cost,
    )(x, w1, b1, w2, b2, w3, b3, w4, b4)

    return out[:n]


def init_params(key):
    """Deterministic init mimicking torch.nn.Linear default (U[-1/sqrt(in), 1/sqrt(in)]).

    Weights are stored as (in_features, out_features) — transposed vs. PyTorch.
    Biases are stored as (1, out_features) so they stay 2-D inside the kernel.
    """
    dims = [(X_IN, H), (H, H), (H, H), (H, X_OUT)]
    params = {}
    for idx, (fan_in, fan_out) in enumerate(dims, start=1):
        key, kw, kb = jax.random.split(key, 3)
        bound = 1.0 / jnp.sqrt(jnp.float32(fan_in))
        params[f"w{idx}"] = jax.random.uniform(
            kw, (fan_in, fan_out), jnp.float32, -bound, bound)
        params[f"b{idx}"] = jax.random.uniform(
            kb, (1, fan_out), jnp.float32, -bound, bound)
    return params


def _reference(x, params):
    h = x
    for i in range(1, 4):
        h = jax.nn.softplus(h @ params[f"w{i}"] + params[f"b{i}"])
    return h @ params["w4"] + params["b4"]


if __name__ == "__main__":
    key = jax.random.PRNGKey(0)
    kp, kx, kx2 = jax.random.split(key, 3)

    params = init_params(kp)

    # Small batch of 2-D "Blob" points, matching x_in=2.
    x = jax.random.normal(kx, (8, X_IN), jnp.float32)
    out = jax.block_until_ready(model_latent_f(x, params))
    ref = _reference(x, params)
    assert out.shape == (8, X_OUT)
    assert jnp.allclose(out, ref, atol=1e-5, rtol=1e-5), "mismatch vs reference"

    # Larger, non-multiple-of-tile batch: exercises N-padding and a multi-step
    # pipelined grid (3 tiles of 1024).
    x_big = jax.random.normal(kx2, (3000, X_IN), jnp.float32)
    out_big = jax.block_until_ready(
        model_latent_f(x_big, params, batch_tile=1024))
    ref_big = _reference(x_big, params)
    assert out_big.shape == (3000, X_OUT)
    assert jnp.allclose(out_big, ref_big, atol=1e-4, rtol=1e-4), \
        "mismatch vs reference (tiled path)"

    print("KERNEL_OK")
</pallas_src>

<mosaic_0001>
module attributes {stable_mosaic.version = 11 : i64} {
  func.func @_mlp_kernel(%arg0: i32, %arg1: memref<8x2xf32, #tpu.memory_space<vmem>>, %arg2: memref<2x128xf32, #tpu.memory_space<vmem>>, %arg3: memref<1x128xf32, #tpu.memory_space<vmem>>, %arg4: memref<128x128xf32, #tpu.memory_space<vmem>>, %arg5: memref<1x128xf32, #tpu.memory_space<vmem>>, %arg6: memref<128x128xf32, #tpu.memory_space<vmem>>, %arg7: memref<1x128xf32, #tpu.memory_space<vmem>>, %arg8: memref<128x50xf32, #tpu.memory_space<vmem>>, %arg9: memref<1x50xf32, #tpu.memory_space<vmem>>, %arg10: memref<8x50xf32, #tpu.memory_space<vmem>>) attributes {dimension_semantics = [#tpu.dimension_semantics<parallel>], iteration_bounds = array<i64: 1>, scalar_prefetch = 0 : i64, scratch_operands = 0 : i64, tpu.core_type = #tpu.core_type<tc>, window_params = [{transform_indices = @transform_0, window_bounds = array<i64: 8, 2>}, {pipeline_mode = #tpu.pipeline_mode<synchronous>, transform_indices = @transform_1, window_bounds = array<i64: 2, 128>}, {pipeline_mode = #tpu.pipeline_mode<synchronous>, transform_indices = @transform_2, window_bounds = array<i64: 1, 128>}, {pipeline_mode = #tpu.pipeline_mode<synchronous>, transform_indices = @transform_3, window_bounds = array<i64: 128, 128>}, {pipeline_mode = #tpu.pipeline_mode<synchronous>, transform_indices = @transform_4, window_bounds = array<i64: 1, 128>}, {pipeline_mode = #tpu.pipeline_mode<synchronous>, transform_indices = @transform_5, window_bounds = array<i64: 128, 128>}, {pipeline_mode = #tpu.pipeline_mode<synchronous>, transform_indices = @transform_6, window_bounds = array<i64: 1, 128>}, {pipeline_mode = #tpu.pipeline_mode<synchronous>, transform_indices = @transform_7, window_bounds = array<i64: 128, 50>}, {pipeline_mode = #tpu.pipeline_mode<synchronous>, transform_indices = @transform_8, window_bounds = array<i64: 1, 50>}, {transform_indices = @transform_9, window_bounds = array<i64: 8, 50>}]} {
    %c0 = arith.constant 0 : index
    %c0_0 = arith.constant 0 : index
    %0 = vector.load %arg1[%c0, %c0_0] : memref<8x2xf32, #tpu.memory_space<vmem>>, vector<8x2xf32>
    %c0_1 = arith.constant 0 : index
    %c0_2 = arith.constant 0 : index
    %1 = vector.load %arg2[%c0_1, %c0_2] : memref<2x128xf32, #tpu.memory_space<vmem>>, vector<2x128xf32>
    %2 = vector.extract_strided_slice %0 {offsets = [0, 0], sizes = [8, 1], strides = [1, 1]} : vector<8x2xf32> to vector<8x1xf32>
    %3 = vector.extract_strided_slice %1 {offsets = [0, 0], sizes = [1, 128], strides = [1, 1]} : vector<2x128xf32> to vector<1x128xf32>
    %4 = vector.broadcast %2 : vector<8x1xf32> to vector<8x128xf32>
    %5 = vector.broadcast %3 : vector<1x128xf32> to vector<8x128xf32>
    %6 = arith.mulf %4, %5 : vector<8x128xf32>
    %7 = vector.extract_strided_slice %0 {offsets = [0, 1], sizes = [8, 1], strides = [1, 1]} : vector<8x2xf32> to vector<8x1xf32>
    %8 = vector.extract_strided_slice %1 {offsets = [1, 0], sizes = [1, 128], strides = [1, 1]} : vector<2x128xf32> to vector<1x128xf32>
    %9 = vector.broadcast %7 : vector<8x1xf32> to vector<8x128xf32>
    %10 = vector.broadcast %8 : vector<1x128xf32> to vector<8x128xf32>
    %11 = arith.mulf %9, %10 : vector<8x128xf32>
    %12 = arith.addf %6, %11 : vector<8x128xf32>
    %c0_3 = arith.constant 0 : index
    %c0_4 = arith.constant 0 : index
    %13 = vector.load %arg3[%c0_3, %c0_4] : memref<1x128xf32, #tpu.memory_space<vmem>>, vector<1x128xf32>
    %14 = vector.broadcast %13 : vector<1x128xf32> to vector<8x128xf32>
    %15 = arith.addf %12, %14 : vector<8x128xf32>
    %cst = arith.constant 2.000000e+01 : f32
    %16 = vector.broadcast %cst : f32 to vector<8x128xf32>
    %17 = arith.cmpf ogt, %15, %16 : vector<8x128xf32>
    %18 = math.exp %15 : vector<8x128xf32>
    %19 = math.log1p %18 : vector<8x128xf32>
    %20 = arith.select %17, %15, %19 : vector<8x128xi1>, vector<8x128xf32>
    %c0_5 = arith.constant 0 : index
    %c0_6 = arith.constant 0 : index
    %21 = vector.load %arg4[%c0_5, %c0_6] : memref<128x128xf32, #tpu.memory_space<vmem>>, vector<128x128xf32>
    %cst_7 = arith.constant dense<0.000000e+00> : vector<8x128xf32>
    %22 = tpu.matmul %20, %21, %cst_7 {dimension_numbers = #tpu.dot_dimension_numbers<[1], [0], [0], [1], [0, 0, 1, 1], [], []>} : vector<8x128xf32>, vector<128x128xf32>, vector<8x128xf32> -> vector<8x128xf32>
    %c0_8 = arith.constant 0 : index
    %c0_9 = arith.constant 0 : index
    %23 = vector.load %arg5[%c0_8, %c0_9] : memref<1x128xf32, #tpu.memory_space<vmem>>, vector<1x128xf32>
    %24 = vector.broadcast %23 : vector<1x128xf32> to vector<8x128xf32>
    %25 = arith.addf %22, %24 : vector<8x128xf32>
    %cst_10 = arith.constant 2.000000e+01 : f32
    %26 = vector.broadcast %cst_10 : f32 to vector<8x128xf32>
    %27 = arith.cmpf ogt, %25, %26 : vector<8x128xf32>
    %28 = math.exp %25 : vector<8x128xf32>
    %29 = math.log1p %28 : vector<8x128xf32>
    %30 = arith.select %27, %25, %29 : vector<8x128xi1>, vector<8x128xf32>
    %c0_11 = arith.constant 0 : index
    %c0_12 = arith.constant 0 : index
    %31 = vector.load %arg6[%c0_11, %c0_12] : memref<128x128xf32, #tpu.memory_space<vmem>>, vector<128x128xf32>
    %cst_13 = arith.constant dense<0.000000e+00> : vector<8x128xf32>
    %32 = tpu.matmul %30, %31, %cst_13 {dimension_numbers = #tpu.dot_dimension_numbers<[1], [0], [0], [1], [0, 0, 1, 1], [], []>} : vector<8x128xf32>, vector<128x128xf32>, vector<8x128xf32> -> vector<8x128xf32>
    %c0_14 = arith.constant 0 : index
    %c0_15 = arith.constant 0 : index
    %33 = vector.load %arg7[%c0_14, %c0_15] : memref<1x128xf32, #tpu.memory_space<vmem>>, vector<1x128xf32>
    %34 = vector.broadcast %33 : vector<1x128xf32> to vector<8x128xf32>
    %35 = arith.addf %32, %34 : vector<8x128xf32>
    %cst_16 = arith.constant 2.000000e+01 : f32
    %36 = vector.broadcast %cst_16 : f32 to vector<8x128xf32>
    %37 = arith.cmpf ogt, %35, %36 : vector<8x128xf32>
    %38 = math.exp %35 : vector<8x128xf32>
    %39 = math.log1p %38 : vector<8x128xf32>
    %40 = arith.select %37, %35, %39 : vector<8x128xi1>, vector<8x128xf32>
    %c0_17 = arith.constant 0 : index
    %c0_18 = arith.constant 0 : index
    %41 = vector.load %arg8[%c0_17, %c0_18] : memref<128x50xf32, #tpu.memory_space<vmem>>, vector<128x50xf32>
    %cst_19 = arith.constant dense<0.000000e+00> : vector<8x50xf32>
    %42 = tpu.matmul %40, %41, %cst_19 {dimension_numbers = #tpu.dot_dimension_numbers<[1], [0], [0], [1], [0, 0, 1, 1], [], []>} : vector<8x128xf32>, vector<128x50xf32>, vector<8x50xf32> -> vector<8x50xf32>
    %c0_20 = arith.constant 0 : index
    %c0_21 = arith.constant 0 : index
    %43 = vector.load %arg9[%c0_20, %c0_21] : memref<1x50xf32, #tpu.memory_space<vmem>>, vector<1x50xf32>
    %44 = vector.broadcast %43 : vector<1x50xf32> to vector<8x50xf32>
    %45 = arith.addf %42, %44 : vector<8x50xf32>
    %c0_22 = arith.constant 0 : index
    %c0_23 = arith.constant 0 : index
    %46 = vector.load %arg10[%c0_22, %c0_23] : memref<8x50xf32, #tpu.memory_space<vmem>>, vector<8x50xf32>
    tpu.vector_store %arg10[%c0_22, %c0_23], %45 {strides = array<i32>} : memref<8x50xf32, #tpu.memory_space<vmem>>, vector<8x50xf32>,
    return
  }
  func.func @transform_0(%arg0: i32) -> (i32, i32) {
    %c0_i32 = arith.constant 0 : i32
    %c0_i32_0 = arith.constant 0 : i32
    return %arg0, %c0_i32 : i32, i32
  }
  func.func @transform_1(%arg0: i32) -> (i32, i32) {
    %c0_i32 = arith.constant 0 : i32
    %c0_i32_0 = arith.constant 0 : i32
    %c0_i32_1 = arith.constant 0 : i32
    return %c0_i32, %c0_i32_0 : i32, i32
  }
  func.func @transform_2(%arg0: i32) -> (i32, i32) {
    %c0_i32 = arith.constant 0 : i32
    %c0_i32_0 = arith.constant 0 : i32
    %c0_i32_1 = arith.constant 0 : i32
    return %c0_i32, %c0_i32_0 : i32, i32
  }
  func.func @transform_3(%arg0: i32) -> (i32, i32) {
    %c0_i32 = arith.constant 0 : i32
    %c0_i32_0 = arith.constant 0 : i32
    %c0_i32_1 = arith.constant 0 : i32
    return %c0_i32, %c0_i32_0 : i32, i32
  }
  func.func @transform_4(%arg0: i32) -> (i32, i32) {
    %c0_i32 = arith.constant 0 : i32
    %c0_i32_0 = arith.constant 0 : i32
    %c0_i32_1 = arith.constant 0 : i32
    return %c0_i32, %c0_i32_0 : i32, i32
  }
  func.func @transform_5(%arg0: i32) -> (i32, i32) {
    %c0_i32 = arith.constant 0 : i32
    %c0_i32_0 = arith.constant 0 : i32
    %c0_i32_1 = arith.constant 0 : i32
    return %c0_i32, %c0_i32_0 : i32, i32
  }
  func.func @transform_6(%arg0: i32) -> (i32, i32) {
    %c0_i32 = arith.constant 0 : i32
    %c0_i32_0 = arith.constant 0 : i32
    %c0_i32_1 = arith.constant 0 : i32
    return %c0_i32, %c0_i32_0 : i32, i32
  }
  func.func @transform_7(%arg0: i32) -> (i32, i32) {
    %c0_i32 = arith.constant 0 : i32
    %c0_i32_0 = arith.constant 0 : i32
    %c0_i32_1 = arith.constant 0 : i32
    return %c0_i32, %c0_i32_0 : i32, i32
  }
  func.func @transform_8(%arg0: i32) -> (i32, i32) {
    %c0_i32 = arith.constant 0 : i32
    %c0_i32_0 = arith.constant 0 : i32
    %c0_i32_1 = arith.constant 0 : i32
    return %c0_i32, %c0_i32_0 : i32, i32
  }
  func.func @transform_9(%arg0: i32) -> (i32, i32) {
    %c0_i32 = arith.constant 0 : i32
    %c0_i32_0 = arith.constant 0 : i32
    return %arg0, %c0_i32 : i32, i32
  }
}

</mosaic_0001>

<bundles_post_ra>
// kernel: tpu_custom_call.1
= control target key start
LH: loop header
LB: loop body
LE: loop exit
PB: predicated region body
PF: predicated region fallthrough
CT: control target
= control target key end

     0   :  { %14 = vsyncpa [#allocation3], 0  ;;  %s939_s0 = inlined_call_operand.vmem [shape: f32[8,2], index: 0, kind: input, shape index: {}]   ;;  %s940_s1 = inlined_call_operand.vmem [shape: f32[2,128], index: 1, kind: input, shape index: {}]   ;;  %s941_s2 = inlined_call_operand.vmem [shape: f32[1,128], index: 2, kind: input, shape index: {}]   ;;  %s942_s3 = inlined_call_operand.vmem [shape: f32[128,128], index: 3, kind: input, shape index: {}]   ;;  %s943_s4 = inlined_call_operand.vmem [shape: f32[1,128], index: 4, kind: input, shape index: {}]   ;;  %s944_s5 = inlined_call_operand.hbm [shape: f32[128,128], index: 5, kind: input, shape index: {}]   ;;  %s945_s6 = inlined_call_operand.vmem [shape: f32[1,128], index: 6, kind: input, shape index: {}]   ;;  %s946_s7 = inlined_call_operand.vmem [shape: f32[128,50], index: 7, kind: input, shape index: {}]   ;;  %s947_s8 = inlined_call_operand.vmem [shape: f32[1,50], index: 8, kind: input, shape index: {}]   ;;  %s948_s9 = inlined_call_operand.hbm [shape: f32[8,50], index: 9, kind: output, shape index: {}]  }
   0x1   :  { %15 = vsyncpa [#allocation4], 0  ;;  %s715_s30 = smov [#allocation2]   ;;  %s667_s13 = scalar_lea.hbm %s944_s5, 2048 }
   0x2   :  { %s31_s10 = sshll.u32 %s715_s30, 4  ;;  %p668_p0 = scmp.ne.s32.totalorder %s944_s5, %s667_s13  ;;  %s32_s10 = int_to_ptr.vmem [resolvable:$true] %s31_s10 }
   0x3   :  { %p671_p1 = scmp.lt.u32.totalorder %s667_s13, %s944_s5 }
   0x5   :  { %p673_p2 = pnand %p671_p1, %p668_p0 }
   0x7   :  { %676 = shalt.err (!%p673_p2)
}
   0x8   :  { %s677_s18 = scalar_lea.vmem %s32_s10, 2048  ;;  %p682_p4 = scmp.lt.s32.totalorder %s32_s10, %s32_s10 }
   0x9   :  { %p678_p3 = scmp.ne.s32.totalorder %s32_s10, %s677_s18  ;;  %p683_p5 = scmp.lt.s32.totalorder %s677_s18, %s677_s18 }
   0xb   :  { %p684_p6 = por %p683_p5, %p682_p4 }
   0xd   :  { %p685_p7 = pnand %p684_p6, %p678_p3 }
   0xf   :  { %688 = shalt.err (!%p685_p7)
}
  0x10   :  { %s716_s19 = smov 128   ;;  %s717_s20 = smov 8  }
  0x11   :  { %37 = dma.hbm_to_vmem [thread:$0]  %s944_s5, 2048, %s32_s10, [#allocation3], %s716_s19, %s716_s19, %s717_s20  }
  0x12   :  { %711 = dma.done.wait [#allocation3], 2048  }
  0x13   :  { %712 = vsyncadd [#allocation3], 4294965248  ;;  %v718_v0 = vmov 0   ;;  %v47_v1 = vld [vmem:[%s939_s0] sm:$0xff]  ;;  %v719_v2 = vmov 1   ;;  %v91_v4 = vld [vmem:[%s942_s3 + $0x8] sm:$0xff]  ;;  %v54_v29 = vlaneseq }
  0x14   :  { %653 = vset.pattern.permute.xlu0 %v718_v0  ;;  %v90_v3 = vld [vmem:[%s942_s3] sm:$0xff]  ;;  %v720_v6 = vmov 0.0|0.0   ;;  %v92_v7 = vld [vmem:[%s942_s3 + $0x10] sm:$0xff]  ;;  %v93_v8 = vld [vmem:[%s942_s3 + $0x18] sm:$0xff]  ;;  %vm721_vm0 = vmmov 0   ;;  %v722_v13 = vmov 0.0  }
  0x15   :  { %51 = vperm.xlu0 %653, %v47_v1   ;;  %v573_v5 = vpack.c.bf16 %v91_v4, %v90_v3  ;;  %572 = vmatprep.subr.bf16.mxu0 %v720_v6  ;;  %v576_v9 = vpack.c.bf16 %v93_v8, %v92_v7  ;;  %v94_v10 = vld [vmem:[%s942_s3 + $0x20] sm:$0xff]  ;;  %v95_v11 = vld [vmem:[%s942_s3 + $0x28] sm:$0xff]  ;;  %v96_v14 = vld [vmem:[%s942_s3 + $0x30] sm:$0xff]  ;;  %v55_v30 = vshrl.u32 %v54_v29, 7  ;;  %s723_s20 = smov [#allocation5]   ;;  %vm395_vm7 = vcmask 408576  }
  0x16   :  { %596 = vmatprep.subr.bf16.mxu1 %v720_v6  ;;  %v579_v12 = vpack.c.bf16 %v95_v11, %v94_v10  ;;  %499 = vmatprep.mubr.msk.f32.mxu0 %vm721_vm0, %v722_v13  ;;  %v97_v15 = vld [vmem:[%s942_s3 + $0x38] sm:$0xff]  ;;  %v98_v17 = vld [vmem:[%s942_s3 + $0x40] sm:$0xff]  ;;  %v99_v18 = vld [vmem:[%s942_s3 + $0x48] sm:$0xff]  ;;  %s403_s21 = sshll.u32 %s723_s20, 4  ;;  %s404_s21 = int_to_ptr.vmem [resolvable:$true] %s403_s21 }
  0x17   :  { %574 = vmatpush3.bf16.msra.mxu0 %v573_v5  ;;  %534 = vmatprep.mubr.msk.f32.mxu1 %vm721_vm0, %v722_v13  ;;  %v582_v16 = vpack.c.bf16 %v97_v15, %v96_v14  ;;  %v585_v19 = vpack.c.bf16 %v99_v18, %v98_v17  ;;  %v100_v20 = vld [vmem:[%s942_s3 + $0x50] sm:$0xff]  ;;  %v101_v21 = vld [vmem:[%s942_s3 + $0x58] sm:$0xff]  ;;  %v102_v23 = vld [vmem:[%s942_s3 + $0x60] sm:$0xff]  ;;  %v56_v31 = vsub.s32 0, %v55_v30  ;;  %v65_v32 = vsub.s32 1, %v55_v30  ;;  %s689_s22 = scalar_lea.vmem %s404_s21, 128  ;;  %p694_p9 = scmp.lt.s32.totalorder %s404_s21, %s404_s21 }
  0x18   :  { %575 = vmatprep.subr.bf16.mxu0 %v720_v6  ;;  %v588_v22 = vpack.c.bf16 %v101_v21, %v100_v20  ;;  %v103_v24 = vld [vmem:[%s942_s3 + $0x68] sm:$0xff]  ;;  %v104_v26 = vld [vmem:[%s942_s3 + $0x70] sm:$0xff]  ;;  %v105_v27 = vld [vmem:[%s942_s3 + $0x78] sm:$0xff]  ;;  %p690_p8 = scmp.ne.s32.totalorder %s404_s21, %s689_s22  ;;  %p695_p10 = scmp.lt.s32.totalorder %s689_s22, %s689_s22 }
  0x19   :  { %654 = vset.pattern.permute.xlu0 %v719_v2  ;;  %v591_v25 = vpack.c.bf16 %v103_v24, %v102_v23  ;;  %v594_v28 = vpack.c.bf16 %v105_v27, %v104_v26  ;;  %v48_v33 = vld [vmem:[%s940_s1] sm:$0x3]  ;;  %v197_v55 = vld [vmem:[#allocation2 + $0x8] sm:$0xff]  ;;  %v198_v57 = vld [vmem:[#allocation2 + $0x10] sm:$0xff] }
  0x1a   :  { %60 = vperm.xlu0 %654, %v47_v1   ;;  %v57_v35 = vrot.slane %v48_v33, %v56_v31  ;;  %v66_v36 = vrot.slane %v48_v33, %v65_v32  ;;  %v412_v40 = vld [vmem:[%s941_s2] ss:$0 sm:$0xff]  ;;  %v199_v58 = vld [vmem:[#allocation2 + $0x18] sm:$0xff]  ;;  %v201_v61 = vld [vmem:[#allocation2 + $0x28] sm:$0xff]  ;;  %p696_p11 = por %p695_p10, %p694_p9 }
  0x1b   :  { %577 = vmatpush3.bf16.msra.mxu0 %v576_v9  ;;  %v196_v54 = vld [vmem:[#allocation2] sm:$0xff]  ;;  %v600_v59 = vpack.c.bf16 %v199_v58, %v198_v57  ;;  %v202_v63 = vld [vmem:[#allocation2 + $0x30] sm:$0xff]  ;;  %v203_v0 = vld [vmem:[#allocation2 + $0x38] sm:$0xff] }
  0x1c   :  { %578 = vmatprep.subr.bf16.mxu0 %v720_v6  ;;  %v597_v56 = vpack.c.bf16 %v197_v55, %v196_v54  ;;  %v200_v60 = vld [vmem:[#allocation2 + $0x20] sm:$0xff]  ;;  %v606_v1 = vpack.c.bf16 %v203_v0, %v202_v63  ;;  %v205_v3 = vld [vmem:[#allocation2 + $0x48] sm:$0xff]  ;;  %v206_v5 = vld [vmem:[#allocation2 + $0x50] sm:$0xff]  ;;  %p697_p12 = pnand %p696_p11, %p690_p8 }
  0x1d   :  { %v603_v62 = vpack.c.bf16 %v201_v61, %v200_v60  ;;  %v204_v2 = vld [vmem:[#allocation2 + $0x40] sm:$0xff]  ;;  %v207_v7 = vld [vmem:[#allocation2 + $0x58] sm:$0xff]  ;;  %v209_v10 = vld [vmem:[#allocation2 + $0x68] sm:$0xff] }
  0x1e   :  { %598 = vmatpush3.bf16.msra.mxu1 %v597_v56  ;;  %v609_v4 = vpack.c.bf16 %v205_v3, %v204_v2  ;;  %v612_v8 = vpack.c.bf16 %v207_v7, %v206_v5  ;;  %v208_v9 = vld [vmem:[#allocation2 + $0x60] sm:$0xff]  ;;  %v303_v31 = vld [vmem:[%s946_s7 + $0x8] sm:$0xff]  ;;  %v304_v33 = vld [vmem:[%s946_s7 + $0x10] sm:$0xff] }
  0x1f   :  { %580 = vmatpush3.bf16.msra.mxu0 %v579_v12  ;;  %599 = vmatprep.subr.bf16.mxu1 %v720_v6  ;;  %v615_v11 = vpack.c.bf16 %v209_v10, %v208_v9  ;;  %v210_v12 = vld [vmem:[#allocation2 + $0x70] sm:$0xff]  ;;  %v413_v15 = vld [vmem:[%s943_s4] ss:$0 sm:$0xff] }
  0x20   :  { %581 = vmatprep.subr.bf16.mxu0 %v720_v6  ;;  %v302_v30 = vld [vmem:[%s946_s7] sm:$0xff] }
  0x21   :  { %v621_v32 = vpack.c.bf16 %v303_v31, %v302_v30  ;;  %v414_v54 = vld [vmem:[%s945_s6] ss:$0 sm:$0xff] }
  0x22   :  { %601 = vmatpush3.bf16.msra.mxu1 %v600_v59 }
  0x23   :  { %583 = vmatpush3.bf16.msra.mxu0 %v582_v16  ;;  %602 = vmatprep.subr.bf16.mxu1 %v720_v6 }
  0x24   :  { %584 = vmatprep.subr.bf16.mxu0 %v720_v6 }
  0x26   :  { %604 = vmatpush3.bf16.msra.mxu1 %v603_v62 }
  0x27   :  { %586 = vmatpush3.bf16.msra.mxu0 %v585_v19  ;;  %605 = vmatprep.subr.bf16.mxu1 %v720_v6 }
  0x28   :  { %587 = vmatprep.subr.bf16.mxu0 %v720_v6 }
  0x2a   :  { %607 = vmatpush3.bf16.msra.mxu1 %v606_v1 }
  0x2b   :  { %589 = vmatpush3.bf16.msra.mxu0 %v588_v22  ;;  %608 = vmatprep.subr.bf16.mxu1 %v720_v6 }
  0x2c   :  { %590 = vmatprep.subr.bf16.mxu0 %v720_v6 }
  0x2e   :  { %610 = vmatpush3.bf16.msra.mxu1 %v609_v4  ;;  %v415_v4 = vld [vmem:[%s947_s8] ss:$0 sm:$0xff] }
  0x2f   :  { %592 = vmatpush3.bf16.msra.mxu0 %v591_v25  ;;  %611 = vmatprep.subr.bf16.mxu1 %v720_v6 }
  0x30   :  { %593 = vmatprep.subr.bf16.mxu0 %v720_v6 }
  0x32   :  { %613 = vmatpush3.bf16.msra.mxu1 %v612_v8 }
  0x33   :  { %595 = vmatpush3.bf16.msra.mxu0 %v594_v28  ;;  %614 = vmatprep.subr.bf16.mxu1 %v720_v6 }
  0x34   :  { %620 = vmatprep.subr.bf16.mxu0 %v720_v6 }
  0x36   :  { %616 = vmatpush3.bf16.msra.mxu1 %v615_v11 }
  0x37   :  { %617 = vmatprep.subr.bf16.mxu1 %v720_v6 }
  0x94   :  { %v52_v34 = vpop.permute.xlu0 %51 }
  0x95   :  { %v58_v38 = vmul.f32 %v57_v35, %v52_v34  ;;  %v305_v34 = vld [vmem:[%s946_s7 + $0x18] sm:$0xff] }
  0x96   :  { %v624_v35 = vpack.c.bf16 %v305_v34, %v304_v33 }
  0x99   :  { %v61_v37 = vpop.permute.xlu0 %60 }
  0x9a   :  { %v67_v39 = vmul.f32 %v66_v36, %v61_v37  ;;  %v306_v36 = vld [vmem:[%s946_s7 + $0x20] sm:$0xff]  ;;  %v307_v37 = vld [vmem:[%s946_s7 + $0x28] sm:$0xff] }
  0x9c   :  { %v68_v41 = vadd.f32 %v67_v39, %v58_v38  ;;  %v627_v38 = vpack.c.bf16 %v307_v37, %v306_v36  ;;  %v308_v39 = vld [vmem:[%s946_s7 + $0x30] sm:$0xff] }
  0x9e   :  { %v76_v42 = vadd.f32 %v412_v40, %v68_v41  ;;  %v309_v40 = vld [vmem:[%s946_s7 + $0x38] sm:$0xff] }
  0x9f   :  { %v630_v41 = vpack.c.bf16 %v309_v40, %v308_v39 }
  0xa0   :  { %v78_v43 = vmul.f32 1.442695, %v76_v42  ;;  %vm77_vm2 = vcmp.gt.f32.partialorder %v76_v42, 20.0 }
  0xa2   :  { %655 = vpow2.f32 %v78_v43  ;;  %v311_v43 = vld [vmem:[%s946_s7 + $0x48] sm:$0xff] }
  0xac   :  { %v656_v44 = vpop.eup %655 }
  0xad   :  { %v80_v45 = vadd.f32 1.0, %v656_v44  ;;  %v83_v46 = vmul.f32 -0.5, %v656_v44  ;;  %v86_v48 = vand.u32 2147483647, %v656_v44 }
  0xaf   :  { %657 = vlog2.f32 %v80_v45  ;;  %v84_v47 = vadd.f32 1.0, %v83_v46  ;;  %vm87_vm1 = vcmp.lt.f32.partialorder %v86_v48, 0.0004427343  ;;  %v312_v45 = vld [vmem:[%s946_s7 + $0x50] sm:$0xff]  ;;  %v313_v46 = vld [vmem:[%s946_s7 + $0x58] sm:$0xff]  ;;  %v314_v48 = vld [vmem:[%s946_s7 + $0x60] sm:$0xff] }
  0xb1   :  { %v85_v51 = vmul.f32 %v656_v44, %v84_v47  ;;  %v636_v47 = vpack.c.bf16 %v313_v46, %v312_v45 }
  0xb9   :  { %v658_v49 = vpop.eup %657 }
  0xba   :  { %v82_v50 = vmul.f32 0.6931472, %v658_v49  ;;  %v315_v49 = vld [vmem:[%s946_s7 + $0x68] sm:$0xff] }
  0xbc   :  { %v88_v52 = vsel %vm87_vm1, %v85_v51, %v82_v50  ;;  %v639_v50 = vpack.c.bf16 %v315_v49, %v314_v48  ;;  %v316_v51 = vld [vmem:[%s946_s7 + $0x70] sm:$0xff] }
  0xbd   :  { %v89_v53 = vsel %vm77_vm2, %v76_v42, %v88_v52  ;;  %v310_v42 = vld [vmem:[%s946_s7 + $0x40] sm:$0xff]  ;;  %v317_v52 = vld [vmem:[%s946_s7 + $0x78] sm:$0xff] }
  0xbe   :  { %500 = vmatmul.mubr.f32.vlgmr.msra.gmra.mrb[0].mxu0 %v89_v53  ;;  %v633_v44 = vpack.c.bf16 %v311_v43, %v310_v42  ;;  %v642_v53 = vpack.c.bf16 %v317_v52, %v316_v51 }
  0xbf   :  { %569 = vmatprep.mubr.msk.f32.mxu0 %vm721_vm0, %v722_v13  ;;  %v211_v13 = vld [vmem:[#allocation2 + $0x78] sm:$0xff]  ;;  %622 = vmatpush3.bf16.msra.mxu0 %v621_v32 }
  0xc0   :  { %v618_v14 = vpack.c.bf16 %v211_v13, %v210_v12  ;;  %623 = vmatprep.subr.bf16.mxu0 %v720_v6 }
  0xc2   :  { %619 = vmatpush3.bf16.msra.mxu1 %v618_v14 }
  0xc3   :  { %625 = vmatpush3.bf16.msra.mxu0 %v624_v35 }
  0xc4   :  { %626 = vmatprep.subr.bf16.mxu0 %v720_v6 }
  0xc7   :  { %628 = vmatpush3.bf16.msra.mxu0 %v627_v38 }
  0xc8   :  { %629 = vmatprep.subr.bf16.mxu0 %v720_v6 }
  0xcb   :  { %631 = vmatpush3.bf16.msra.mxu0 %v630_v41 }
  0xcc   :  { %632 = vmatprep.subr.bf16.mxu0 %v720_v6 }
  0xcf   :  { %634 = vmatpush3.bf16.msra.mxu0 %v633_v44 }
  0xd0   :  { %635 = vmatprep.subr.bf16.mxu0 %v720_v6 }
  0xd3   :  { %637 = vmatpush3.bf16.msra.mxu0 %v636_v47 }
  0xd4   :  { %638 = vmatprep.subr.bf16.mxu0 %v720_v6 }
  0xd7   :  { %640 = vmatpush3.bf16.msra.mxu0 %v639_v50 }
  0xd8   :  { %641 = vmatprep.subr.bf16.mxu0 %v720_v6 }
  0xdb   :  { %643 = vmatpush3.bf16.msra.mxu0 %v642_v53 }
 0x191   :  { %v179_v16 = vpop.f32.mrb[0].mxu0 }
 0x192   :  { %v180_v17 = vadd.f32 %v413_v15, %v179_v16  ;;  %v501_v18 = vpop.f32.mrb[1].mxu0 }
 0x194   :  { %v184_v19 = vmul.f32 1.442695, %v180_v17  ;;  %vm183_vm4 = vcmp.gt.f32.partialorder %v180_v17, 20.0 }
 0x196   :  { %659 = vpow2.f32 %v184_v19 }
 0x1a0   :  { %v660_v20 = vpop.eup %659 }
 0x1a1   :  { %v186_v21 = vadd.f32 1.0, %v660_v20  ;;  %v189_v22 = vmul.f32 -0.5, %v660_v20  ;;  %v192_v24 = vand.u32 2147483647, %v660_v20 }
 0x1a3   :  { %661 = vlog2.f32 %v186_v21  ;;  %v190_v23 = vadd.f32 1.0, %v189_v22  ;;  %vm193_vm3 = vcmp.lt.f32.partialorder %v192_v24, 0.0004427343 }
 0x1a5   :  { %v191_v27 = vmul.f32 %v660_v20, %v190_v23 }
 0x1ad   :  { %v662_v25 = vpop.eup %661 }
 0x1ae   :  { %v188_v26 = vmul.f32 0.6931472, %v662_v25 }
 0x1b0   :  { %v194_v28 = vsel %vm193_vm3, %v191_v27, %v188_v26 }
 0x1b1   :  { %v195_v29 = vsel %vm183_vm4, %v180_v17, %v194_v28 }
 0x1b2   :  { %535 = vmatmul.mubr.f32.vlgmr.msra.gmra.mrb[0].mxu1 %v195_v29 }
 0x285   :  { %v285_v55 = vpop.f32.mrb[0].mxu1 }
 0x286   :  { %v286_v56 = vadd.f32 %v414_v54, %v285_v55  ;;  %v536_v57 = vpop.f32.mrb[1].mxu1 }
 0x288   :  { %v290_v58 = vmul.f32 1.442695, %v286_v56  ;;  %vm289_vm6 = vcmp.gt.f32.partialorder %v286_v56, 20.0 }
 0x28a   :  { %663 = vpow2.f32 %v290_v58 }
 0x294   :  { %v664_v59 = vpop.eup %663 }
 0x295   :  { %v292_v60 = vadd.f32 1.0, %v664_v59  ;;  %v295_v61 = vmul.f32 -0.5, %v664_v59  ;;  %v298_v63 = vand.u32 2147483647, %v664_v59 }
 0x297   :  { %665 = vlog2.f32 %v292_v60  ;;  %v296_v62 = vadd.f32 1.0, %v295_v61  ;;  %vm299_vm5 = vcmp.lt.f32.partialorder %v298_v63, 0.0004427343 }
 0x299   :  { %v297_v2 = vmul.f32 %v664_v59, %v296_v62 }
 0x2a1   :  { %v666_v0 = vpop.eup %665 }
 0x2a2   :  { %v294_v1 = vmul.f32 0.6931472, %v666_v0 }
 0x2a4   :  { %v300_v6 = vsel %vm299_vm5, %v297_v2, %v294_v1 }
 0x2a5   :  { %v301_v3 = vsel %vm289_vm6, %v286_v56, %v300_v6 }
 0x2a6   :  { %570 = vmatmul.mubr.f32.vlgmr.msra.gmra.mrb[2].mxu0 %v301_v3 }
 0x379   :  { %v391_v5 = vpop.f32.mrb[2].mxu0 }
 0x37a   :  { %v392_v7 = vadd.f32 %v415_v4, %v391_v5  ;;  %v571_v8 = vpop.f32.mrb[3].mxu0 }
 0x37c   :  { %396 = vst.msk [vmem:[#allocation5] sm:$0xff] %vm395_vm7, %v392_v7 }
 0x37d   :  { %700 = shalt.err (!%p697_p12)
}
 0x37e   :  { %s701_s25 = scalar_lea.hbm %s948_s9, 128 }
 0x37f   :  { %p702_p13 = scmp.ne.s32.totalorder %s948_s9, %s701_s25  ;;  %p705_p0 = scmp.lt.u32.totalorder %s701_s25, %s948_s9 }
 0x381   :  { %p707_p1 = pnand %p705_p0, %p702_p13 }
 0x383   :  { %710 = shalt.err (!%p707_p1)
}
 0x384   :  { %406 = dma.vmem_to_hbm [thread:$0]  %s404_s21, 128, %s948_s9, [#allocation4]  }
 0x385   :  { %713 = dma.done.wait [#allocation4], 128  }
 0x386   :  { %714 = vsyncadd [#allocation4], 4294967168 }
 0x387   :  { %410 = vsyncpa [#allocation3], 1 }
 0x388   :  { %411 = vsyncpa [#allocation4], 1 }

</bundles_post_ra>
